<compile_context>
chip_gen: v5e
topology: v5e:2x2
jax: 0.10.0
libtpu: 0.0.40
codegen_flags: <defaults>
</compile_context>

<pallas_src>
import functools

import jax
import jax.numpy as jnp
from jax.experimental import pallas as pl
from jax.experimental.pallas import tpu as pltpu

COMPUTE_DTYPE = jnp.bfloat16   # MXU operand dtype (accumulation is f32).
                               # Set to jnp.float32 for full-precision convs.


# ---------------------------------------------------------------------------
# Kernels
# ---------------------------------------------------------------------------

def _imagepool_kernel(x_ref, w_ref, s_ref, b_ref, o_ref, sum_ref, *,
                      TH, W, Cin, Cout, HW):
    """Row-tiled global average pool -> 1x1 conv -> folded BN -> ReLU.

    Produces only the (1, Cout) pooled feature per batch element; the spatial
    broadcast back to HxW is done in the fused kernel's epilogue.
    """
    r = pl.program_id(1)

    @pl.when(r == 0)
    def _init():
        sum_ref[...] = jnp.zeros_like(sum_ref)

    x = x_ref[...]                                            # (1, TH, W, Cin) f32
    sum_ref[...] += jnp.sum(x[0].reshape(TH * W, Cin), axis=0, keepdims=True)

    @pl.when(r == pl.num_programs(1) - 1)
    def _finalize():
        mean = sum_ref[...] * (1.0 / HW)                      # (1, Cin) f32
        y = jnp.dot(mean.astype(w_ref.dtype), w_ref[...],
                    preferred_element_type=jnp.float32)       # (1, Cout)
        y = jnp.maximum(y * s_ref[...] + b_ref[...], 0.0)
        o_ref[0, :, :] = y


def _fused_aspp_kernel(xp_hbm, pool_ref, w0_ref, wt_ref, s_ref, b_ref, o_ref,
                       xbuf, sem, acc_ref, *,
                       TH, W, Wp, Cin, TK, Cout, d_max, rates):
    """c0 (1x1 conv) + all dilated 3x3 branches for one (batch, row-tile) block.

    xp_hbm : (B, Hp, Wp, Cin) zero-padded NHWC input (pad = max(rates)), left in HBM.
    The TH + 2*d_max row window is DMA'd manually in Cin chunks of size TK
    (double-buffered).  Per-branch accumulation is f32 in a VMEM scratch; the
    epilogue applies folded BN + ReLU and writes the channel-concatenated tile.
    """
    batch = pl.program_id(0)
    r = pl.program_id(1)
    n_k = Cin // TK
    n_conv = 1 + len(rates)
    TH2 = TH + 2 * d_max
    row0 = r * TH
    if TH & (TH - 1) == 0:                       # alignment hint when TH is a pow2
        row0 = pl.multiple_of(row0, TH)

    def copy_desc(k, slot):
        if TK == Cin:
            src = xp_hbm.at[batch, pl.ds(row0, TH2), :, :]
        else:
            src = xp_hbm.at[batch, pl.ds(row0, TH2), :, k * TK:(k + 1) * TK]
        return pltpu.make_async_copy(src, xbuf.at[slot], sem.at[slot])

    copy_desc(0, 0).start()                      # prime the first Cin chunk
    acc_ref[...] = jnp.zeros_like(acc_ref)       # zeroing overlaps with the DMA

    for k in range(n_k):                         # static (unrolled) Cin-chunk loop
        slot = k % 2
        copy_desc(k, slot).wait()
        if k + 1 < n_k:                          # prefetch next chunk
            copy_desc(k + 1, 1 - slot).start()

        # c0: 1x1 conv on the interior (no halo).
        centre = xbuf[slot, d_max:d_max + TH, d_max:d_max + W, :].reshape(TH * W, TK)
        w0k = w0_ref[k * TK:(k + 1) * TK, :]
        acc_ref[0, :, :] += jnp.dot(centre, w0k, preferred_element_type=jnp.float32)

        # dilated 3x3 branches: 9 shifted pointwise matmuls each.
        for jr, d in enumerate(rates):
            off = d_max - d
            for t in range(9):
                ky, kx = divmod(t, 3)
                patch = xbuf[slot,
                             off + ky * d:off + ky * d + TH,
                             off + kx * d:off + kx * d + W,
                             :].reshape(TH * W, TK)
                w_tap = wt_ref[jr * 9 + t, k * TK:(k + 1) * TK, :]
                acc_ref[jr + 1, :, :] += jnp.dot(
                    patch, w_tap, preferred_element_type=jnp.float32)

    # Epilogue: folded BN + ReLU, write the channel-concatenated output tile.
    out_dtype = o_ref.dtype
    pool_vec = pool_ref[...].reshape(1, Cout)                 # already BN + ReLU'd
    o_ref[0, :, :, 0:Cout] = jnp.broadcast_to(
        pool_vec, (TH * W, Cout)).reshape(TH, W, Cout).astype(out_dtype)
    for j in range(n_conv):
        y = acc_ref[j, :, :] * s_ref[j, :, :] + b_ref[j, :, :]
        y = jnp.maximum(y, 0.0)
        o_ref[0, :, :, (j + 1) * Cout:(j + 2) * Cout] = y.reshape(
            TH, W, Cout).astype(out_dtype)


# ---------------------------------------------------------------------------
# Wrappers (pallas_call plumbing)
# ---------------------------------------------------------------------------

def _pick_row_tile(H, cap=8):
    """Largest divisor of H that is <= cap (rows per output tile)."""
    return max(t for t in range(1, min(H, cap) + 1) if H % t == 0)


def _pick_k_tile(Cin):
    """Cin chunk size for the in-kernel reduction loop."""
    for tk in (512, 256, 128):
        if Cin % tk == 0:
            return tk
    return Cin


def _fold_bn(gamma, beta, mean, var, eps=1e-5):
    scale = gamma / jnp.sqrt(var + eps)
    bias = beta - mean * scale
    return scale.astype(jnp.float32), bias.astype(jnp.float32)


def imagepool_branch(x_nhwc, w, scale, bias, TH):
    B, H, W, Cin = x_nhwc.shape
    Cout = w.shape[1]
    kernel = functools.partial(_imagepool_kernel,
                               TH=TH, W=W, Cin=Cin, Cout=Cout, HW=H * W)
    return pl.pallas_call(
        kernel,
        out_shape=jax.ShapeDtypeStruct((B, 1, Cout), jnp.float32),
        grid=(B, H // TH),
        in_specs=[
            pl.BlockSpec((1, TH, W, Cin), lambda b, r: (b, r, 0, 0)),
            pl.BlockSpec((Cin, Cout), lambda b, r: (0, 0)),
            pl.BlockSpec((1, Cout), lambda b, r: (0, 0)),
            pl.BlockSpec((1, Cout), lambda b, r: (0, 0)),
        ],
        out_specs=pl.BlockSpec((1, 1, Cout), lambda b, r: (b, 0, 0)),
        scratch_shapes=[pltpu.VMEM((1, Cin), jnp.float32)],
        compiler_params=pltpu.CompilerParams(
            dimension_semantics=("parallel", "arbitrary"),
            vmem_limit_bytes=32 * 1024 * 1024),
    )(x_nhwc, w, scale, bias)


def fused_aspp_branches(xp, pool_feat, w0, w_taps, scale_cat, bias_cat, *,
                        rates, H, W, TH, d_max, out_dtype):
    B, _, Wp, Cin = xp.shape
    Cout = w0.shape[1]
    n_rates = len(rates)
    n_conv = 1 + n_rates
    Ctot = (2 + n_rates) * Cout
    TK = _pick_k_tile(Cin)
    kernel = functools.partial(
        _fused_aspp_kernel, TH=TH, W=W, Wp=Wp, Cin=Cin, TK=TK, Cout=Cout,
        d_max=d_max, rates=tuple(rates))
    return pl.pallas_call(
        kernel,
        out_shape=jax.ShapeDtypeStruct((B, H, W, Ctot), out_dtype),
        grid=(B, H // TH),
        in_specs=[
            pl.BlockSpec(memory_space=pl.ANY),                               # padded x (HBM)
            pl.BlockSpec((1, 1, Cout), lambda b, r: (b, 0, 0)),              # pooled feature
            pl.BlockSpec((Cin, Cout), lambda b, r: (0, 0)),                  # c0 weights
            pl.BlockSpec((n_rates * 9, Cin, Cout), lambda b, r: (0, 0, 0)),  # 3x3 taps
            pl.BlockSpec((n_conv, 1, Cout), lambda b, r: (0, 0, 0)),         # BN scales
            pl.BlockSpec((n_conv, 1, Cout), lambda b, r: (0, 0, 0)),         # BN biases
        ],
        out_specs=pl.BlockSpec((1, TH, W, Ctot), lambda b, r: (b, r, 0, 0)),
        scratch_shapes=[
            pltpu.VMEM((2, TH + 2 * d_max, Wp, TK), xp.dtype),  # dbl-buffered input window
            pltpu.SemaphoreType.DMA((2,)),
            pltpu.VMEM((n_conv, TH * W, Cout), jnp.float32),    # f32 accumulators
        ],
        compiler_params=pltpu.CompilerParams(
            dimension_semantics=("parallel", "parallel"),
            vmem_limit_bytes=32 * 1024 * 1024),
    )(xp, pool_feat, w0, w_taps, scale_cat, bias_cat)


# ---------------------------------------------------------------------------
# Parameter init (deterministic, synthetic) and ASPP forward
# ---------------------------------------------------------------------------

def init_aspp_params(key, n_in, n_out, rates, compute_dtype=COMPUTE_DTYPE):
    """Synthetic params.  Conv weights are created in PyTorch OIHW layout and
    converted to kernel layouts; conv bias is absent (folded BN supplies the
    affine part, as in _ConvBnReLU)."""
    n_rates = len(rates)
    keys = jax.random.split(key, 2 + n_rates)

    def bn_parts(k):
        kg, kb, km, kv = jax.random.split(k, 4)
        gamma = 1.0 + 0.1 * jax.random.normal(kg, (n_out,), jnp.float32)
        beta = 0.1 * jax.random.normal(kb, (n_out,), jnp.float32)
        mean = 0.1 * jax.random.normal(km, (n_out,), jnp.float32)
        var = jnp.abs(jax.random.normal(kv, (n_out,), jnp.float32)) + 0.5
        return _fold_bn(gamma, beta, mean, var)

    # image-pool branch: 1x1 conv
    kw, kbn = jax.random.split(keys[0])
    w = 0.1 * jax.random.normal(kw, (n_out, n_in, 1, 1), jnp.float32)        # OIHW
    s, b = bn_parts(kbn)
    params = {
        "pool_w": jnp.transpose(w[:, :, 0, 0]).astype(compute_dtype),        # (Cin, Cout)
        "pool_s": s.reshape(1, n_out),
        "pool_b": b.reshape(1, n_out),
    }

    scales, biases = [], []

    # c0: 1x1 conv
    kw, kbn = jax.random.split(keys[1])
    w = 0.1 * jax.random.normal(kw, (n_out, n_in, 1, 1), jnp.float32)
    params["w0"] = jnp.transpose(w[:, :, 0, 0]).astype(compute_dtype)
    s, b = bn_parts(kbn)
    scales.append(s)
    biases.append(b)

    # c1..cN: 3x3 dilated convs
    taps = []
    for i in range(n_rates):
        kw, kbn = jax.random.split(keys[2 + i])
        w = 0.1 * jax.random.normal(kw, (n_out, n_in, 3, 3), jnp.float32)    # OIHW
        taps.append(jnp.transpose(w, (2, 3, 1, 0)).reshape(9, n_in, n_out))  # HWIO, flat taps
        s, b = bn_parts(kbn)
        scales.append(s)
        biases.append(b)
    params["w_taps"] = jnp.concatenate(taps, axis=0).astype(compute_dtype)   # (n_rates*9, Cin, Cout)
    params["scale_cat"] = jnp.stack(scales)[:, None, :]                      # (1+n_rates, 1, Cout)
    params["bias_cat"] = jnp.stack(biases)[:, None, :]
    return params


def aspp_forward(x_nchw, params, rates):
    """_ASPP.forward: concat([imagepool+upsample, c0, c1..cN], channel dim).

    Accepts / returns PyTorch-style NCHW; kernels operate on NHWC internally.
    """
    rates = tuple(int(r) for r in rates)
    x = jnp.transpose(x_nchw, (0, 2, 3, 1))                  # NCHW -> NHWC
    _, H, W, _ = x.shape
    TH = _pick_row_tile(H)
    d_max = max(rates)

    # image-pool branch -> (B, 1, Cout); broadcast happens inside the fused epilogue
    pool_feat = imagepool_branch(x, params["pool_w"], params["pool_s"],
                                 params["pool_b"], TH)

    # pad ONCE with max(rate), shared by every dilated branch; bf16 for the MXU path
    xp = jnp.pad(x, ((0, 0), (d_max, d_max), (d_max, d_max), (0, 0))
                 ).astype(COMPUTE_DTYPE)

    out = fused_aspp_branches(xp, pool_feat, params["w0"], params["w_taps"],
                              params["scale_cat"], params["bias_cat"],
                              rates=rates, H=H, W=W, TH=TH, d_max=d_max,
                              out_dtype=x_nchw.dtype)
    return jnp.transpose(out, (0, 3, 1, 2))                  # NHWC -> NCHW


# ---------------------------------------------------------------------------
# Pure-JAX reference (same bf16-rounded weights, f32 activations)
# ---------------------------------------------------------------------------

def aspp_reference(x_nchw, params, rates):
    x = jnp.transpose(x_nchw, (0, 2, 3, 1)).astype(jnp.float32)
    B, H, W, Cin = x.shape
    Cout = params["w0"].shape[1]
    s = params["scale_cat"].astype(jnp.float32)
    bb = params["bias_cat"].astype(jnp.float32)

    outs = []
    pooled = jnp.mean(x, axis=(1, 2))                                        # (B, Cin)
    yp = pooled @ params["pool_w"].astype(jnp.float32)
    yp = jnp.maximum(yp * params["pool_s"] + params["pool_b"], 0.0)          # (B, Cout)
    outs.append(jnp.broadcast_to(yp[:, None, None, :], (B, H, W, Cout)))

    y0 = jnp.einsum("bhwc,co->bhwo", x, params["w0"].astype(jnp.float32))
    outs.append(jnp.maximum(y0 * s[0] + bb[0], 0.0))

    for j, d in enumerate(rates):
        w = params["w_taps"][j * 9:(j + 1) * 9].astype(jnp.float32)
        w = w.reshape(3, 3, Cin, Cout)                                       # HWIO
        y = jax.lax.conv_general_dilated(
            x, w, window_strides=(1, 1), padding=((d, d), (d, d)),
            rhs_dilation=(d, d), dimension_numbers=("NHWC", "HWIO", "NHWC"))
        outs.append(jnp.maximum(y * s[j + 1] + bb[j + 1], 0.0))

    h = jnp.concatenate(outs, axis=-1)
    return jnp.transpose(h, (0, 3, 1, 2))


if __name__ == "__main__":
    key = jax.random.PRNGKey(0)
    B, n_in, H, W = 2, 4, 16, 16
    n_out = 4
    rates = (1, 2)

    kx, kp = jax.random.split(key)
    x = jax.random.normal(kx, (B, n_in, H, W), jnp.float32)   # NCHW, like PyTorch
    params = init_aspp_params(kp, n_in, n_out, rates)

    y = aspp_forward(x, params, rates)
    y = jax.block_until_ready(y)

    expected_c = (2 + len(rates)) * n_out
    assert y.shape == (B, expected_c, H, W), y.shape
    assert y.dtype == jnp.float32
    assert bool(jnp.all(jnp.isfinite(y)))

    y_ref = aspp_reference(x, params, rates)
    max_err = float(jnp.max(jnp.abs(y - y_ref)))
    assert bool(jnp.allclose(y, y_ref, rtol=5e-2, atol=5e-2)), max_err
    print("KERNEL_OK")
</pallas_src>

<mosaic_0001>
module attributes {stable_mosaic.version = 11 : i64} {
  func.func @_imagepool_kernel(%arg0: i32, %arg1: i32, %arg2: memref<1x8x16x4xf32, #tpu.memory_space<vmem>>, %arg3: memref<4x4xbf16, #tpu.memory_space<vmem>>, %arg4: memref<1x4xf32, #tpu.memory_space<vmem>>, %arg5: memref<1x4xf32, #tpu.memory_space<vmem>>, %arg6: memref<1x1x4xf32, #tpu.memory_space<vmem>>, %arg7: memref<1x4xf32, #tpu.memory_space<vmem>>) attributes {dimension_semantics = [#tpu.dimension_semantics<parallel>, #tpu.dimension_semantics<arbitrary>], iteration_bounds = array<i64: 2, 2>, scalar_prefetch = 0 : i64, scratch_operands = 1 : i64, tpu.core_type = #tpu.core_type<tc>, window_params = [{transform_indices = @transform_0, window_bounds = array<i64: 1, 8, 16, 4>}, {pipeline_mode = #tpu.pipeline_mode<synchronous>, transform_indices = @transform_1, window_bounds = array<i64: 4, 4>}, {pipeline_mode = #tpu.pipeline_mode<synchronous>, transform_indices = @transform_2, window_bounds = array<i64: 1, 4>}, {pipeline_mode = #tpu.pipeline_mode<synchronous>, transform_indices = @transform_3, window_bounds = array<i64: 1, 4>}, {transform_indices = @transform_4, window_bounds = array<i64: 1, 1, 4>}]} {
    %c0_i32 = arith.constant 0 : i32
    %0 = arith.cmpi eq, %arg1, %c0_i32 : i32
    %1 = arith.extui %0 : i1 to i32
    %c0_i32_0 = arith.constant 0 : i32
    %2 = arith.cmpi ne, %1, %c0_i32_0 : i32
    scf.if %2 {
      %cst_9 = arith.constant 0.000000e+00 : f32
      %14 = vector.broadcast %cst_9 : f32 to vector<1x4xf32>
      %c0_10 = arith.constant 0 : index
      %c0_11 = arith.constant 0 : index
      %15 = vector.load %arg7[%c0_10, %c0_11] : memref<1x4xf32, #tpu.memory_space<vmem>>, vector<1x4xf32>
      tpu.vector_store %arg7[%c0_10, %c0_11], %14 {strides = array<i32>} : memref<1x4xf32, #tpu.memory_space<vmem>>, vector<1x4xf32>,
    } else {
    }
    %c0 = arith.constant 0 : index
    %c0_1 = arith.constant 0 : index
    %c0_2 = arith.constant 0 : index
    %c0_3 = arith.constant 0 : index
    %3 = vector.load %arg2[%c0, %c0_1, %c0_2, %c0_3] : memref<1x8x16x4xf32, #tpu.memory_space<vmem>>, vector<1x8x16x4xf32>
    %c0_4 = arith.constant 0 : index
    %c0_5 = arith.constant 0 : index
    %4 = vector.load %arg7[%c0_4, %c0_5] : memref<1x4xf32, #tpu.memory_space<vmem>>, vector<1x4xf32>
    %5 = vector.shape_cast %3 : vector<1x8x16x4xf32> to vector<8x16x4xf32>
    %6 = vector.shape_cast %5 : vector<8x16x4xf32> to vector<128x4xf32>
    %cst = arith.constant dense<0.000000e+00> : vector<4xf32>
    %7 = vector.multi_reduction <add>, %6, %cst [0] : vector<128x4xf32> to vector<4xf32>
    %8 = vector.shape_cast %7 : vector<4xf32> to vector<1x4xf32>
    %9 = arith.addf %4, %8 : vector<1x4xf32>
    %c0_6 = arith.constant 0 : index
    %c0_7 = arith.constant 0 : index
    %10 = vector.load %arg7[%c0_6, %c0_7] : memref<1x4xf32, #tpu.memory_space<vmem>>, vector<1x4xf32>
    tpu.vector_store %arg7[%c0_6, %c0_7], %9 {strides = array<i32>} : memref<1x4xf32, #tpu.memory_space<vmem>>, vector<1x4xf32>,
    %c1_i32 = arith.constant 1 : i32
    %11 = arith.cmpi eq, %arg1, %c1_i32 : i32
    %12 = arith.extui %11 : i1 to i32
    %c0_i32_8 = arith.constant 0 : i32
    %13 = arith.cmpi ne, %12, %c0_i32_8 : i32
    scf.if %13 {
      %c0_9 = arith.constant 0 : index
      %c0_10 = arith.constant 0 : index
      %14 = vector.load %arg7[%c0_9, %c0_10] : memref<1x4xf32, #tpu.memory_space<vmem>>, vector<1x4xf32>
      %cst_11 = arith.constant 3.906250e-03 : f32
      %15 = vector.broadcast %cst_11 : f32 to vector<1x4xf32>
      %16 = arith.mulf %14, %15 : vector<1x4xf32>
      %17 = arith.truncf %16 : vector<1x4xf32> to vector<1x4xbf16>
      %c0_12 = arith.constant 0 : index
      %c0_13 = arith.constant 0 : index
      %18 = vector.load %arg3[%c0_12, %c0_13] : memref<4x4xbf16, #tpu.memory_space<vmem>>, vector<4x4xbf16>
      %cst_14 = arith.constant dense<0.000000e+00> : vector<1x4xf32>
      %19 = tpu.matmul %17, %18, %cst_14 {dimension_numbers = #tpu.dot_dimension_numbers<[1], [0], [0], [1], [0, 0, 1, 1], [], []>} : vector<1x4xbf16>, vector<4x4xbf16>, vector<1x4xf32> -> vector<1x4xf32>
      %c0_15 = arith.constant 0 : index
      %c0_16 = arith.constant 0 : index
      %20 = vector.load %arg4[%c0_15, %c0_16] : memref<1x4xf32, #tpu.memory_space<vmem>>, vector<1x4xf32>
      %21 = arith.mulf %19, %20 : vector<1x4xf32>
      %c0_17 = arith.constant 0 : index
      %c0_18 = arith.constant 0 : index
      %22 = vector.load %arg5[%c0_17, %c0_18] : memref<1x4xf32, #tpu.memory_space<vmem>>, vector<1x4xf32>
      %23 = arith.addf %21, %22 : vector<1x4xf32>
      %cst_19 = arith.constant 0.000000e+00 : f32
      %24 = vector.broadcast %cst_19 : f32 to vector<1x4xf32>
      %25 = arith.maximumf %23, %24 : vector<1x4xf32>
      %c0_20 = arith.constant 0 : index
      %c0_21 = arith.constant 0 : index
      %c0_22 = arith.constant 0 : index
      %26 = vector.load %arg6[%c0_20, %c0_21, %c0_22] : memref<1x1x4xf32, #tpu.memory_space<vmem>>, vector<1x1x4xf32>
      %27 = vector.shape_cast %26 : vector<1x1x4xf32> to vector<1x4xf32>
      %28 = vector.shape_cast %25 : vector<1x4xf32> to vector<1x1x4xf32>
      tpu.vector_store %arg6[%c0_20, %c0_21, %c0_22], %28 {strides = array<i32>} : memref<1x1x4xf32, #tpu.memory_space<vmem>>, vector<1x1x4xf32>,
    } else {
    }
    return
  }
  func.func @transform_0(%arg0: i32, %arg1: i32) -> (i32, i32, i32, i32) {
    %c0_i32 = arith.constant 0 : i32
    %c0_i32_0 = arith.constant 0 : i32
    %c0_i32_1 = arith.constant 0 : i32
    return %arg0, %arg1, %c0_i32, %c0_i32_0 : i32, i32, i32, i32
  }
  func.func @transform_1(%arg0: i32, %arg1: i32) -> (i32, i32) {
    %c0_i32 = arith.constant 0 : i32
    %c0_i32_0 = arith.constant 0 : i32
    %c0_i32_1 = arith.constant 0 : i32
    return %c0_i32, %c0_i32_0 : i32, i32
  }
  func.func @transform_2(%arg0: i32, %arg1: i32) -> (i32, i32) {
    %c0_i32 = arith.constant 0 : i32
    %c0_i32_0 = arith.constant 0 : i32
    %c0_i32_1 = arith.constant 0 : i32
    return %c0_i32, %c0_i32_0 : i32, i32
  }
  func.func @transform_3(%arg0: i32, %arg1: i32) -> (i32, i32) {
    %c0_i32 = arith.constant 0 : i32
    %c0_i32_0 = arith.constant 0 : i32
    %c0_i32_1 = arith.constant 0 : i32
    return %c0_i32, %c0_i32_0 : i32, i32
  }
  func.func @transform_4(%arg0: i32, %arg1: i32) -> (i32, i32, i32) {
    %c0_i32 = arith.constant 0 : i32
    %c0_i32_0 = arith.constant 0 : i32
    %c0_i32_1 = arith.constant 0 : i32
    return %arg0, %c0_i32, %c0_i32_0 : i32, i32, i32
  }
}

</mosaic_0001>

<bundles_post_ra>
// kernel: tpu_custom_call.1
= control target key start
LH: loop header
LB: loop body
LE: loop exit
PB: predicated region body
PF: predicated region fallthrough
CT: control target
= control target key end

     0   :  { %9 = vsyncpa [#allocation4], 0  ;;  %s795_s0 = inlined_call_operand.vmem [shape: f32[2,16,16,4], index: 0, kind: input, shape index: {}]   ;;  %s796_s1 = inlined_call_operand.vmem [shape: bf16[4,4], index: 1, kind: input, shape index: {}]   ;;  %s797_s2 = inlined_call_operand.vmem [shape: f32[1,4], index: 2, kind: input, shape index: {}]   ;;  %s798_s3 = inlined_call_operand.vmem [shape: f32[1,4], index: 3, kind: input, shape index: {}]   ;;  %s799_s4 = inlined_call_operand.hbm [shape: f32[2,1,4], index: 4, kind: output, shape index: {}]  }
   0x1   :  { %11 = vsyncpa [#allocation4 + $0x1], 0  ;;  %s621_s15 = smov 0   ;;  %s623_s16 = smov 0  }
   0x2   :  { %s625_s17 = smov 0   ;;  %s627_s18 = smov 0  }
   0x3   :  { %s629_s19 = smov 0   ;;  %s631_s20 = smov 0  }
   0x4   :  { %s633_s21 = smov 0   ;;  %s635_s22 = smov 0  }
   0x5 LB: > { %s413_s23 = sadd.s32 4294967295, %s593_s22   ;;  %s414_s24 = sadd.s32 4294967294, %s593_s22   ;;  %s593_s22 = sphi %s635_s22, %s17_s22   ;;  %s589_s21 = sphi %s633_s21, %s808_s21   ;;  %s585_s20 = sphi %s631_s20, %s807_s20   ;;  %s581_s19 = sphi %s629_s19, %s806_s19   ;;  %s577_s18 = sphi %s627_s18, %s805_s18   ;;  %s573_s17 = sphi %s625_s17, %s804_s17   ;;  %s569_s16 = sphi %s623_s16, %s803_s16   ;;  %s565_s15 = sphi %s621_s15, %s802_s15  }
   0x6   : > { %s26_s25 = sadd.s32 1, %s585_s20  ;;  %s29_s26 = sadd.s32 1, %s589_s21 }
   0x7   : > { %p27_p0 = scmp.ge.s32.totalorder %s26_s25, 2  ;;  %p137_p1 = scmp.ne.s32.totalorder %s573_s17, %s569_s16 }
   0x8   : > { %p138_p2 = scmp.eq.s32.totalorder %s413_s23, 3  ;;  %p143_p4 = scmp.ne.s32.totalorder %s569_s16, %s565_s15 }
   0x9   : > { %s810_s25 = smov (%p27_p0, %s26_s25), 0  ;;  %s812_s26 = smov (!%p27_p0, %s29_s26), %s589_s21 }
   0xa   : > { %p670_p3 = por %p138_p2, %p137_p1  ;;  %p31_p5 = scmp.ge.s32.totalorder %s812_s26, 2 }
   0xb   : > { %p144_p6 = scmp.eq.s32.totalorder %s414_s24, 3  ;;  %p417_p7 = scmp.ge.s32.totalorder %s593_s22, 1 }
   0xc   : > { %p185_p8 = scmp.lt.s32.totalorder %s593_s22, 5  ;;  %s814_s26 = smov (%p31_p5, %s812_s26), 0 }
   0xd   : > { %p680_p9 = por %p144_p6, %p143_p4  ;;  %s124_s29 = ssub.s32 %s589_s21, %s814_s26 }
   0xe   : > { %p186_p10 = pnand %p417_p7, %p185_p8  ;;  %s127_s30 = sadd.s32 1, %s573_s17 }
   0xf   : > { %p125_p11 = scmp.eq.s32.totalorder %s124_s29, 0  ;;  %s213_s6 = sand.u32 (!%p186_p10), 1, %s569_s16  }
  0x10   : > { %189 = sbr.rel (%p186_p10) target bundleno = 235 (0xeb), region = 36  ;;  %s418_s7 = sshll.u32 (!%p186_p10), %s577_s18, 3 }
  0x11   : > { %s688_s5 = scalar_select %p125_p11, %s573_s17, %s127_s30  }
  0x12   : > { %p216_p12 = scmp.lt.s32.totalorder (!%p186_p10), %s581_s19, 1  ;;  %p218_p13 = scmp.lt.s32.totalorder (!%p186_p10), %s418_s7, 15 }
  0x13   : > { %s701_s24 = scalar_lea.vmem (!%p186_p10), [#allocation3], %s213_s6  ;;  %p422_p0 = scmp.ne.s32.totalorder (!%p186_p10), %s577_s18, 0 }
  0x15   : > { %s217_s8 = scalar_select %p216_p12, %s581_s19, 1 }
  0x16   : > { %s816_s7 = smov (!%p218_p13, %s418_s7), 15  ;;  %230 = sbr.rel (%p422_p0) target bundleno = 29 (0x1d), region = 40 }
  0x17   : > { %s420_s9 = sshll.u32 %s217_s8, 5  ;;  %s419_s10 = sshll.u32 %s816_s7, 1 }
  0x18   : > { %s222_s11 = sadd.s32 %s420_s9, %s419_s10 }
  0x19   : > { %s421_s12 = sshll.u32 %s222_s11, 3 }
  0x1a   : > { %s697_s23 = scalar_lea.vmem %s795_s0, %s421_s12 }
  0x1b   : > { %vm231_vm0 = vcmask 24576   ;;  %v595_v0 = vmov 0.0  }
  0x1c   : > { %232 = vst.msk [vmem:[#allocation2] sm:$0x1] %vm231_vm0, %v595_v0 }
  0x1d PF: > { %v233_v1 = vld [vmem:[%s697_s23] sm:$0xff]  ;;  %v234_v2 = vld [vmem:[%s697_s23 + $0x8] sm:$0xff]  ;;  %v235_v3 = vld [vmem:[%s697_s23 + $0x10] sm:$0xff]  ;;  %vm250_vm1 = vcmask 31744   ;;  %vm289_vm2 = vcmask 24576   ;;  %p423_p1 = scmp.ne.s32.totalorder %s577_s18, 1 }
  0x1e   : > { %v236_v4 = vld [vmem:[%s697_s23 + $0x18] sm:$0xff]  ;;  %v251_v5 = vsel %vm250_vm1, %v233_v1, 0.0  ;;  %v252_v6 = vsel %vm250_vm1, %v234_v2, 0.0  ;;  %v254_v7 = vsel %vm250_vm1, %v235_v3, 0.0  ;;  %v237_v8 = vld [vmem:[%s697_s23 + $0x20] sm:$0xff]  ;;  %v238_v11 = vld [vmem:[%s697_s23 + $0x28] sm:$0xff] }
  0x1f   : > { %v253_v9 = vadd.f32 %v252_v6, %v251_v5  ;;  %v256_v10 = vsel %vm250_vm1, %v236_v4, 0.0  ;;  %v258_v13 = vsel %vm250_vm1, %v237_v8, 0.0  ;;  %v239_v14 = vld [vmem:[%s697_s23 + $0x30] sm:$0xff]  ;;  %v260_v16 = vsel %vm250_vm1, %v238_v11, 0.0  ;;  %v240_v17 = vld [vmem:[%s697_s23 + $0x38] sm:$0xff]  ;;  %v241_v20 = vld [vmem:[%s697_s23 + $0x40] sm:$0xff] }
  0x20   : > { %v262_v19 = vsel %vm250_vm1, %v239_v14, 0.0  ;;  %v264_v22 = vsel %vm250_vm1, %v240_v17, 0.0  ;;  %v242_v23 = vld [vmem:[%s697_s23 + $0x48] sm:$0xff]  ;;  %v266_v25 = vsel %vm250_vm1, %v241_v20, 0.0  ;;  %v243_v26 = vld [vmem:[%s697_s23 + $0x50] sm:$0xff]  ;;  %v244_v29 = vld [vmem:[%s697_s23 + $0x58] sm:$0xff] }
  0x21   : > { %v255_v12 = vadd.f32 %v254_v7, %v253_v9  ;;  %v268_v28 = vsel %vm250_vm1, %v242_v23, 0.0  ;;  %v270_v31 = vsel %vm250_vm1, %v243_v26, 0.0  ;;  %v245_v32 = vld [vmem:[%s697_s23 + $0x60] sm:$0xff]  ;;  %v272_v34 = vsel %vm250_vm1, %v244_v29, 0.0  ;;  %v246_v35 = vld [vmem:[%s697_s23 + $0x68] sm:$0xff]  ;;  %v247_v38 = vld [vmem:[%s697_s23 + $0x70] sm:$0xff] }
  0x22   : > { %v274_v37 = vsel %vm250_vm1, %v245_v32, 0.0  ;;  %v276_v40 = vsel %vm250_vm1, %v246_v35, 0.0  ;;  %v248_v41 = vld [vmem:[%s697_s23 + $0x78] sm:$0xff]  ;;  %v278_v43 = vsel %vm250_vm1, %v247_v38, 0.0 }
  0x23   : > { %v257_v15 = vadd.f32 %v256_v10, %v255_v12  ;;  %v280_v45 = vsel %vm250_vm1, %v248_v41, 0.0  ;;  %v249_v53 = vld [vmem:[#allocation2] sm:$0x1] }
  0x25   : > { %v259_v18 = vadd.f32 %v258_v13, %v257_v15 }
  0x27   : > { %v261_v21 = vadd.f32 %v260_v16, %v259_v18 }
  0x29   : > { %v263_v24 = vadd.f32 %v262_v19, %v261_v21 }
  0x2b   : > { %v265_v27 = vadd.f32 %v264_v22, %v263_v24 }
  0x2d   : > { %v267_v30 = vadd.f32 %v266_v25, %v265_v27 }
  0x2f   : > { %v269_v33 = vadd.f32 %v268_v28, %v267_v30 }
  0x31   : > { %v271_v36 = vadd.f32 %v270_v31, %v269_v33 }
  0x33   : > { %v273_v39 = vadd.f32 %v272_v34, %v271_v36 }
  0x35   : > { %v275_v42 = vadd.f32 %v274_v37, %v273_v39 }
  0x37   : > { %v277_v44 = vadd.f32 %v276_v40, %v275_v42 }
  0x39   : > { %v279_v46 = vadd.f32 %v278_v43, %v277_v44 }
  0x3b   : > { %v281_v47 = vadd.f32 %v280_v45, %v279_v46 }
  0x3d   : > { %v282_v48 = vrot.slane %v281_v47, 4 }
  0x3f   : > { %v283_v49 = vadd.f32 %v282_v48, %v281_v47 }
  0x41   : > { %v284_v50 = vrot.slane %v283_v49, 2 }
  0x43   : > { %v285_v51 = vadd.f32 %v284_v50, %v283_v49 }
  0x45   : > { %v286_v52 = vrot.slane %v285_v51, 1 }
  0x47   : > { %v287_v54 = vadd.f32 %v286_v52, %v285_v51  ;;  %294 = sbr.rel (%p423_p1) target bundleno = 221 (0xdd), region = 44 }
  0x49   : > { %v288_v55 = vadd.f32 %v287_v54, %v249_v53 }
  0x4b   : > { %290 = vst.msk [vmem:[#allocation2] sm:$0x1] %vm289_vm2, %v288_v55 }
  0x4c   : > { %v298_v56 = vld [vmem:[%s796_s1] sm:$0x3]  ;;  %vm302_vm3 = vcmask 1041408  }
  0x4d   : > { %v304_v58 = vsel %vm302_vm3, %v298_v56, 0  ;;  %v319_v61 = vld [vmem:[%s797_s2] sm:$0x1] }
  0x4e   : > { %313 = vmatpush.bf16.msra.mxu0 %v304_v58  ;;  %v321_v63 = vld [vmem:[%s798_s3] sm:$0x1] }
  0x52   : > { %v295_v57 = vld [vmem:[#allocation2] sm:$0x1] }
  0x53   : > { %v296_v59 = vmul.f32 0.00390625, %v295_v57 }
  0x55   : > { %v297_v60 = vpack.c.bf16 %v296_v59, %v296_v59 }
  0x57   : > { %424 = vmatmul.msk.bf16.vlgmr.msra.gmra.mxu0 %vm250_vm1, %v297_v60 }
  0xd4   : > { %v315_v62 = vpop.f32.mrf.mxu0 }
  0xd5   : > { %v320_v0 = vmul.f32 %v319_v61, %v315_v62 }
  0xd7   : > { %v322_v1 = vadd.f32 %v321_v63, %v320_v0 }
  0xd9   : > { %v323_v2 = vmax.f32 %v322_v1, 0.0 }
  0xdb   : > { %324 = vst.msk [vmem:[%s701_s24] sm:$0x1] %vm289_vm2, %v323_v2 }
  0xdc   : > { %v317_v3 = vpop.f32.mrf.mxu0 }
  0xdd PF: > { %s334_s12 = scalar_lea.hbm %s799_s4, %s581_s19  ;;  %s336_s13 = sshll.u32 %s701_s24, 4  ;;  %s337_s13 = int_to_ptr.vmem [resolvable:$true] %s336_s13 }
  0xde   : > { %s338_s14 = sshll.u32 %s334_s12, 4  ;;  %s326_s23 = scalar_lea.sflag [#allocation4], %s213_s6  ;;  %s339_s14 = int_to_ptr.hbm [resolvable:$true] %s338_s14 }
  0xdf   : > { %s513_s29 = sshra.s32 %s339_s14, 4  ;;  %s519_s18 = scalar_lea.hbm %s799_s4, 2  ;;  %s514_s29 = int_to_ptr.hbm [resolvable:$true] %s513_s29 }
  0xe0   : > { %s515_s30 = scalar_lea.hbm %s514_s29, 1  ;;  %p520_p6 = scmp.lt.s32.totalorder %s514_s29, %s799_s4 }
  0xe1   : > { %p516_p2 = scmp.ne.s32.totalorder %s514_s29, %s515_s30  ;;  %p521_p7 = scmp.lt.s32.totalorder %s519_s18, %s515_s30 }
  0xe3   : > { %p517_p4 = pnand %p516_p2, %p670_p3  ;;  %p522_p8 = por %p521_p7, %p520_p6 }
  0xe5   : > { %p518_p5 = pneg %p517_p4 }
  0xe7   : > { %p523_p10 = pnand %p522_p8, %p518_p5 }
  0xe9   : > { %526 = shalt.err (!%p523_p10)
}
  0xea   : > { %427 = dma.vmem_to_hbm [thread:$0]  (%p670_p3), %s337_s13, 16, %s339_s14, %s326_s23  }
  0xeb PF: > { %p433_p11 = scmp.ge.s32.totalorder %s593_s22, 2  ;;  %s350_s19 = sand.u32 1, %s565_s15  }
  0xec   : > { %s351_s6 = scalar_lea.sflag [#allocation4], %s350_s19 }
  0xed   : > { %p430_p12 = pnand %p433_p11, %p680_p9 }
  0xef   : > { %p431_p13 = pneg %p430_p12 }
  0xf1   : > { %560 = dma.done.wait (%p431_p13), %s351_s6, 16  }
  0xf2   : > { %562 = vsyncadd (%p431_p13), %s351_s6, 4294967280  ;;  %s17_s22 = sadd.s32 1, %s593_s22   ;;  %s802_s15 = smov %s569_s16 }
  0xf3   : > { %p14_p0 = scmp.ge.s32.totalorder %s17_s22, 6   ;;  %s803_s16 = smov %s573_s17 }
  0xf4   : > { %s804_s17 = smov %s688_s5  ;;  %s805_s18 = smov %s585_s20 }
  0xf5   : > { %s806_s19 = smov %s589_s21  ;;  %s807_s20 = smov %s810_s25 }
  0xf6   : > { %s808_s21 = smov %s814_s26  ;;  %16 = sbr.rel (!%p14_p0) target bundleno = 5 (0x5), region = 79 }
  0xfb   :  { %356 = vsyncpa [#allocation4], 1 }
  0xfc   :  { %358 = vsyncpa [#allocation4 + $0x1], 1 }

</bundles_post_ra>
